<compile_context>
chip_gen: v7x
topology: tpu7x:2x2x1
jax: 0.10.0
libtpu: 0.0.40
codegen_flags: <defaults>
</compile_context>

<pallas_src>
import functools

import jax
import jax.numpy as jnp
from jax.experimental import pallas as pl
from jax.experimental.pallas import tpu as pltpu

NUM_PARAMS = 6
_PARAM_KEYS = ("sti", "tr", "edt", "c80", "d50", "ts")
# (out_channels, kernel, stride, padding) of the room-parametric predictor conv stack.
_RP_CONV_LAYERS = [(384, 3, 1, 1), (384, 3, 1, 1), (384, 5, 3, 0), (384, 3, 1, 1)]


def _round_up(x, m):
    return ((x + m - 1) // m) * m


def _cdiv(a, b):
    return -(-a // b)


def _tpu_physical_vmem_bytes():
    try:
        return int(pltpu.get_tpu_info().vmem_capacity_bytes)
    except Exception:
        return 64 * 1024 * 1024  # conservative fallback (v7x per-core physical)


def _plan(B, T, itemsize):
    """Pick (Tt, n_split, nt_per, nt_total, fold_width, vmem_limit_bytes)."""
    physical = _tpu_physical_vmem_bytes()
    # Pred double-buffer budget: v5e/v6e -> 24 MiB (12 MiB of pred bytes per
    # step), v7x (64 MiB physical) -> 16 MiB (8 MiB per step).
    budget = max(8 << 20, min(24 << 20, physical // 4))
    b_pad = max(_round_up(B, 8), 8)                      # sublane padding
    per_col = NUM_PARAMS * 2 * itemsize * b_pad          # bytes per time column, double-buffered
    tt_budget = max(128, (budget // per_col) // 128 * 128)

    T128 = _round_up(T, 128)
    # Split the time range in two so v7x's second TensorCore can take half the
    # HBM stream ("parallel" leading grid axis); harmless on 1-TC chips.
    n_split = 2 if T128 >= 256 else 1
    per_split = _round_up(_cdiv(T128, n_split), 128)
    Tt = min(tt_budget, per_split)
    nt_per = _cdiv(per_split, Tt)
    nt_total = _cdiv(T, Tt)

    # Lane-fold width for the VMEM accumulators (must divide Tt).
    fold = 512 if Tt % 512 == 0 else (256 if Tt % 256 == 0 else 128)

    pred_bufs = NUM_PARAMS * 2 * itemsize * b_pad * Tt
    acc_bytes = (NUM_PARAMS + 1) * b_pad * fold * 4
    need = pred_bufs + acc_bytes + (4 << 20)             # small refs, outputs, headroom
    vmem_limit = int(min(max(need, 32 << 20), physical - (8 << 20)))
    return Tt, n_split, nt_per, nt_total, fold, vmem_limit


# ---------------------------------------------------------------------------
# Pallas kernel: masked per-row partial sums (+ counts) for the 6 parameters
# ---------------------------------------------------------------------------
def _partials_kernel(lens_ref, gts_ref,
                     sti_ref, tr_ref, edt_ref, c80_ref, d50_ref, ts_ref,
                     out_ref, sum_acc, cnt_acc, *, mode, nt_per):
    """Accumulate masked per-row sums.

    mode == "train": SmoothL1(pred - gt) terms (beta=1).
    mode == "val":   raw pred values (masked temporal means).

    lens_ref: (B,1) i32   gts_ref: (6,B,1) f32   pred refs: (B,Tt) tiles
    out_ref:  (1, 7, B, 1) f32 -- rows 0..5 per-param row sums, row 6 counts.
    sum_acc:  (6, B, Fw) f32 VMEM    cnt_acc: (B, Fw) f32 VMEM
    """
    s = pl.program_id(0)
    t = pl.program_id(1)
    nt = pl.num_programs(1)
    B, Tt = sti_ref.shape
    Fw = sum_acc.shape[-1]
    n_fold = Tt // Fw

    @pl.when(t == 0)
    def _init():
        sum_acc[...] = jnp.zeros_like(sum_acc)
        cnt_acc[...] = jnp.zeros_like(cnt_acc)

    # Fused validity mask for this tile (unclamped column index, so tiles past
    # T / duplicated clamped tiles contribute exactly zero).
    col0 = (s * nt_per + t) * Tt
    col = jax.lax.broadcasted_iota(jnp.int32, (B, Tt), 1) + col0
    valid = col < lens_ref[...]                                    # (B, Tt) bool

    def lane_fold(x):                                              # (B,Tt) -> (B,Fw), pure VALU
        acc = x[:, 0:Fw]
        for j in range(1, n_fold):
            acc = acc + x[:, j * Fw:(j + 1) * Fw]
        return acc

    cnt_acc[...] += lane_fold(valid.astype(jnp.float32))

    if mode == "train":
        g = gts_ref[...]                                           # (6, B, 1), hoisted
    pred_refs = (sti_ref, tr_ref, edt_ref, c80_ref, d50_ref, ts_ref)
    for p in range(NUM_PARAMS):
        x = pred_refs[p][...].astype(jnp.float32)
        if mode == "train":
            d = x - g[p]                                           # (B, Tt) - (B, 1)
            ad = jnp.abs(d)
            v = jnp.where(ad < 1.0, 0.5 * d * d, ad - 0.5)         # SmoothL1, beta=1
        else:
            v = x
        # select (not multiply): garbage / NaN in padded tail columns never leaks
        sum_acc[p] += lane_fold(jnp.where(valid, v, 0.0))

    @pl.when(t == nt - 1)
    def _finalize():
        # Single cross-lane reduce per accumulator, once per split.
        for p in range(NUM_PARAMS):
            out_ref[0, p] = jnp.sum(sum_acc[p], axis=1, keepdims=True)          # (B, 1)
        out_ref[0, NUM_PARAMS] = jnp.sum(cnt_acc[...], axis=1, keepdims=True)   # (B, 1)


# ---------------------------------------------------------------------------
# pallas_call wrapper
# ---------------------------------------------------------------------------
def _masked_partials(preds_list, gts, lens, mode):
    B, T = preds_list[0].shape
    itemsize = jnp.dtype(preds_list[0].dtype).itemsize
    Tt, n_split, nt_per, nt_total, fold, vmem_limit = _plan(B, T, itemsize)

    def pred_map(s, t):
        # Clamp so over-extended tiles re-read the last block (their
        # contribution is masked out via the unclamped column index).
        return (0, jnp.minimum(s * nt_per + t, nt_total - 1))

    pred_spec = pl.BlockSpec((B, Tt), pred_map)
    kernel = functools.partial(_partials_kernel, mode=mode, nt_per=nt_per)

    out = pl.pallas_call(
        kernel,
        out_shape=jax.ShapeDtypeStruct((n_split, NUM_PARAMS + 1, B, 1), jnp.float32),
        grid_spec=pltpu.PrefetchScalarGridSpec(
            num_scalar_prefetch=0,
            grid=(n_split, nt_per),
            in_specs=[pl.BlockSpec((B, 1), lambda s, t: (0, 0)),                 # lens (resident)
                      pl.BlockSpec((NUM_PARAMS, B, 1), lambda s, t: (0, 0, 0))]  # gts  (resident)
                     + [pred_spec] * NUM_PARAMS,
            out_specs=pl.BlockSpec((1, NUM_PARAMS + 1, B, 1),
                                   lambda s, t: (s, 0, 0, 0)),
            scratch_shapes=[pltpu.VMEM((NUM_PARAMS, B, fold), jnp.float32),
                            pltpu.VMEM((B, fold), jnp.float32)]),
        compiler_params=pltpu.CompilerParams(
            dimension_semantics=("parallel", "arbitrary"),
            vmem_limit_bytes=vmem_limit),
    )(lens, gts, *preds_list)

    partials = out[..., 0]                                   # (n_split, 7, B)
    sums = jnp.sum(partials[:, :NUM_PARAMS, :], axis=0)      # (6, B) per-row masked sums
    counts = jnp.sum(partials[:, NUM_PARAMS, :], axis=0)     # (B,)  per-row valid counts
    return sums, counts


# ---------------------------------------------------------------------------
# Plain-JAX glue (conv output-length formula, dict plumbing) -- fully traceable
# ---------------------------------------------------------------------------
def _get_param_pred_output_lengths(input_lengths):
    lengths = input_lengths.astype(jnp.float32)
    for _, k, s, p in _RP_CONV_LAYERS:
        lengths = jnp.floor((lengths + 2 * p - (k - 1) - 1) / s + 1)
    return lengths.astype(jnp.int32)


def rp_multitask_loss(param_hat, param_groundtruth, phase):
    assert phase in ("train", "val"), f"Invalid phase: {phase}"
    preds_list = [param_hat[k + "_hat"] for k in _PARAM_KEYS]          # 6x (B, T), read once
    shapes = {p.shape for p in preds_list}
    assert len(shapes) == 1, "all six prediction tracks must share a shape"
    B, T = preds_list[0].shape
    gts = jnp.stack([param_groundtruth[k].astype(jnp.float32)
                     for k in _PARAM_KEYS])[..., None]                 # (6, B, 1), tiny

    padding_mask = param_hat.get("padding_mask", None)
    if padding_mask is None:
        lens = jnp.full((B, 1), T, jnp.int32)
    else:
        # Trace-friendly reproduction of the reference `padding_mask.any()` branch.
        input_lengths = jnp.sum(1 - padding_mask.astype(jnp.int32), axis=-1)     # (B,)
        out_lens = jnp.clip(_get_param_pred_output_lengths(input_lengths), 0, T)
        lens = jnp.where(jnp.any(padding_mask), out_lens,
                         jnp.int32(T)).astype(jnp.int32)[:, None]                # (B, 1)

    sums, counts = _masked_partials(preds_list, gts, lens, phase)

    if phase == "train":
        # SmoothL1 mean over all valid (b, t) elements, jointly per parameter.
        losses = jnp.sum(sums, axis=1) / jnp.sum(counts)               # (6,)
        return {f"loss_{k}": losses[i] for i, k in enumerate(_PARAM_KEYS)}

    # val: masked temporal means, then batch-mean L1 and |Pearson corr| per param.
    pm = sums / counts                                                 # (6, B)
    gt = gts[..., 0]                                                   # (6, B)
    l1 = jnp.mean(jnp.abs(pm - gt), axis=1)                            # (6,)
    dx = pm - jnp.mean(pm, axis=1, keepdims=True)
    dy = gt - jnp.mean(gt, axis=1, keepdims=True)
    corr = jnp.abs(jnp.sum(dx * dy, axis=1)) * jax.lax.rsqrt(
        jnp.sum(dx * dx, axis=1) * jnp.sum(dy * dy, axis=1))           # (6,)
    out = {f"loss_{k}": l1[i] for i, k in enumerate(_PARAM_KEYS)}
    out.update({f"corr_{k}": corr[i] for i, k in enumerate(_PARAM_KEYS)})
    return out


# ---------------------------------------------------------------------------
if __name__ == "__main__":
    key = jax.random.PRNGKey(0)
    B, L_IN = 4, 80
    # conv-output sequence length for an un-padded input of length L_IN
    T = int(_get_param_pred_output_lengths(jnp.array([L_IN], jnp.int32))[0])     # -> 26

    k_pred, k_gt = jax.random.split(key)
    preds = jax.random.normal(k_pred, (NUM_PARAMS, B, T), jnp.float32)
    gts = jax.random.normal(k_gt, (NUM_PARAMS, B), jnp.float32)

    # raw-waveform padding mask: True on padded frames
    input_lengths = jnp.array([80, 65, 50, 38], jnp.int32)
    padding_mask = jnp.arange(L_IN, dtype=jnp.int32)[None, :] >= input_lengths[:, None]  # (B, L_IN)

    param_hat = {k + "_hat": preds[i] for i, k in enumerate(_PARAM_KEYS)}
    param_hat["padding_mask"] = padding_mask
    param_gt = {k: gts[i] for i, k in enumerate(_PARAM_KEYS)}

    train_out = rp_multitask_loss(param_hat, param_gt, "train")
    val_out = rp_multitask_loss(param_hat, param_gt, "val")
    jax.block_until_ready(train_out)
    jax.block_until_ready(val_out)
    print("KERNEL_OK")
</pallas_src>

<mosaic_0001>
module attributes {stable_mosaic.version = 11 : i64} {
  func.func @_partials_kernel(%arg0: i32, %arg1: i32, %arg2: memref<4x1xi32, #tpu.memory_space<vmem>>, %arg3: memref<6x4x1xf32, #tpu.memory_space<vmem>>, %arg4: memref<4x128xf32, #tpu.memory_space<vmem>>, %arg5: memref<4x128xf32, #tpu.memory_space<vmem>>, %arg6: memref<4x128xf32, #tpu.memory_space<vmem>>, %arg7: memref<4x128xf32, #tpu.memory_space<vmem>>, %arg8: memref<4x128xf32, #tpu.memory_space<vmem>>, %arg9: memref<4x128xf32, #tpu.memory_space<vmem>>, %arg10: memref<1x7x4x1xf32, #tpu.memory_space<vmem>>, %arg11: memref<6x4x128xf32, #tpu.memory_space<vmem>>, %arg12: memref<4x128xf32, #tpu.memory_space<vmem>>) attributes {dimension_semantics = [#tpu.dimension_semantics<parallel>, #tpu.dimension_semantics<arbitrary>], iteration_bounds = array<i64: 1, 1>, scalar_prefetch = 0 : i64, scratch_operands = 2 : i64, tpu.core_type = #tpu.core_type<tc>, window_params = [{pipeline_mode = #tpu.pipeline_mode<synchronous>, transform_indices = @transform_0, window_bounds = array<i64: 4, 1>}, {pipeline_mode = #tpu.pipeline_mode<synchronous>, transform_indices = @transform_1, window_bounds = array<i64: 6, 4, 1>}, {transform_indices = @transform_2, window_bounds = array<i64: 4, 128>}, {transform_indices = @transform_3, window_bounds = array<i64: 4, 128>}, {transform_indices = @transform_4, window_bounds = array<i64: 4, 128>}, {transform_indices = @transform_5, window_bounds = array<i64: 4, 128>}, {transform_indices = @transform_6, window_bounds = array<i64: 4, 128>}, {transform_indices = @transform_7, window_bounds = array<i64: 4, 128>}, {transform_indices = @transform_8, window_bounds = array<i64: 1, 7, 4, 1>}]} {
    %c0_i32 = arith.constant 0 : i32
    %0 = arith.cmpi eq, %arg1, %c0_i32 : i32
    %1 = arith.extui %0 : i1 to i32
    %c0_i32_0 = arith.constant 0 : i32
    %2 = arith.cmpi ne, %1, %c0_i32_0 : i32
    scf.if %2 {
      %cst_77 = arith.constant 0.000000e+00 : f32
      %153 = vector.broadcast %cst_77 : f32 to vector<6x4x128xf32>
      %c0_78 = arith.constant 0 : index
      %c0_79 = arith.constant 0 : index
      %c0_80 = arith.constant 0 : index
      %154 = vector.load %arg11[%c0_78, %c0_79, %c0_80] : memref<6x4x128xf32, #tpu.memory_space<vmem>>, vector<6x4x128xf32>
      tpu.vector_store %arg11[%c0_78, %c0_79, %c0_80], %153 {strides = array<i32>} : memref<6x4x128xf32, #tpu.memory_space<vmem>>, vector<6x4x128xf32>,
      %cst_81 = arith.constant 0.000000e+00 : f32
      %155 = vector.broadcast %cst_81 : f32 to vector<4x128xf32>
      %c0_82 = arith.constant 0 : index
      %c0_83 = arith.constant 0 : index
      %156 = vector.load %arg12[%c0_82, %c0_83] : memref<4x128xf32, #tpu.memory_space<vmem>>, vector<4x128xf32>
      tpu.vector_store %arg12[%c0_82, %c0_83], %155 {strides = array<i32>} : memref<4x128xf32, #tpu.memory_space<vmem>>, vector<4x128xf32>,
    } else {
    }
    %c1_i32 = arith.constant 1 : i32
    %3 = arith.muli %arg0, %c1_i32 : i32
    %4 = arith.addi %3, %arg1 : i32
    %c128_i32 = arith.constant 128 : i32
    %5 = arith.muli %4, %c128_i32 : i32
    %6 = tpu.iota {dimensions = array<i32: 1>} : vector<4x128xi32>
    %7 = vector.broadcast %5 : i32 to vector<4x128xi32>
    %8 = arith.addi %6, %7 : vector<4x128xi32>
    %c0 = arith.constant 0 : index
    %c0_1 = arith.constant 0 : index
    %9 = vector.load %arg2[%c0, %c0_1] : memref<4x1xi32, #tpu.memory_space<vmem>>, vector<4x1xi32>
    %10 = vector.broadcast %9 : vector<4x1xi32> to vector<4x128xi32>
    %11 = arith.cmpi slt, %8, %10 : vector<4x128xi32>
    %c0_2 = arith.constant 0 : index
    %c0_3 = arith.constant 0 : index
    %12 = vector.load %arg12[%c0_2, %c0_3] : memref<4x128xf32, #tpu.memory_space<vmem>>, vector<4x128xf32>
    %13 = arith.extui %11 : vector<4x128xi1> to vector<4x128xi32>
    %14 = arith.sitofp %13 : vector<4x128xi32> to vector<4x128xf32>
    %15 = arith.addf %12, %14 : vector<4x128xf32>
    %c0_4 = arith.constant 0 : index
    %c0_5 = arith.constant 0 : index
    %16 = vector.load %arg12[%c0_4, %c0_5] : memref<4x128xf32, #tpu.memory_space<vmem>>, vector<4x128xf32>
    tpu.vector_store %arg12[%c0_4, %c0_5], %15 {strides = array<i32>} : memref<4x128xf32, #tpu.memory_space<vmem>>, vector<4x128xf32>,
    %c0_6 = arith.constant 0 : index
    %c0_7 = arith.constant 0 : index
    %c0_8 = arith.constant 0 : index
    %17 = vector.load %arg3[%c0_6, %c0_7, %c0_8] : memref<6x4x1xf32, #tpu.memory_space<vmem>>, vector<6x4x1xf32>
    %c0_9 = arith.constant 0 : index
    %c0_10 = arith.constant 0 : index
    %18 = vector.load %arg4[%c0_9, %c0_10] : memref<4x128xf32, #tpu.memory_space<vmem>>, vector<4x128xf32>
    %19 = vector.extract_strided_slice %17 {offsets = [0, 0, 0], sizes = [1, 4, 1], strides = [1, 1, 1]} : vector<6x4x1xf32> to vector<1x4x1xf32>
    %20 = vector.shape_cast %19 : vector<1x4x1xf32> to vector<4x1xf32>
    %21 = vector.broadcast %20 : vector<4x1xf32> to vector<4x128xf32>
    %22 = arith.subf %18, %21 : vector<4x128xf32>
    %23 = math.absf %22 : vector<4x128xf32>
    %cst = arith.constant 1.000000e+00 : f32
    %24 = vector.broadcast %cst : f32 to vector<4x128xf32>
    %25 = arith.cmpf olt, %23, %24 : vector<4x128xf32>
    %cst_11 = arith.constant 5.000000e-01 : f32
    %26 = vector.broadcast %cst_11 : f32 to vector<4x128xf32>
    %27 = arith.mulf %26, %22 : vector<4x128xf32>
    %28 = arith.mulf %27, %22 : vector<4x128xf32>
    %cst_12 = arith.constant 5.000000e-01 : f32
    %29 = vector.broadcast %cst_12 : f32 to vector<4x128xf32>
    %30 = arith.subf %23, %29 : vector<4x128xf32>
    %31 = arith.select %25, %28, %30 : vector<4x128xi1>, vector<4x128xf32>
    %c0_13 = arith.constant 0 : index
    %c0_14 = arith.constant 0 : index
    %c0_15 = arith.constant 0 : index
    %32 = vector.load %arg11[%c0_13, %c0_14, %c0_15] : memref<6x4x128xf32, #tpu.memory_space<vmem>>, vector<1x4x128xf32>
    %33 = vector.shape_cast %32 : vector<1x4x128xf32> to vector<4x128xf32>
    %cst_16 = arith.constant 0.000000e+00 : f32
    %34 = vector.broadcast %cst_16 : f32 to vector<4x128xf32>
    %35 = arith.select %11, %31, %34 : vector<4x128xi1>, vector<4x128xf32>
    %36 = arith.addf %33, %35 : vector<4x128xf32>
    %c0_17 = arith.constant 0 : index
    %c0_18 = arith.constant 0 : index
    %c0_19 = arith.constant 0 : index
    %37 = vector.load %arg11[%c0_17, %c0_18, %c0_19] : memref<6x4x128xf32, #tpu.memory_space<vmem>>, vector<1x4x128xf32>
    %38 = vector.shape_cast %37 : vector<1x4x128xf32> to vector<4x128xf32>
    %39 = vector.shape_cast %36 : vector<4x128xf32> to vector<1x4x128xf32>
    tpu.vector_store %arg11[%c0_17, %c0_18, %c0_19], %39 {strides = array<i32>} : memref<6x4x128xf32, #tpu.memory_space<vmem>>, vector<1x4x128xf32>,
    %c0_20 = arith.constant 0 : index
    %c0_21 = arith.constant 0 : index
    %40 = vector.load %arg5[%c0_20, %c0_21] : memref<4x128xf32, #tpu.memory_space<vmem>>, vector<4x128xf32>
    %41 = vector.extract_strided_slice %17 {offsets = [1, 0, 0], sizes = [1, 4, 1], strides = [1, 1, 1]} : vector<6x4x1xf32> to vector<1x4x1xf32>
    %42 = vector.shape_cast %41 : vector<1x4x1xf32> to vector<4x1xf32>
    %43 = vector.broadcast %42 : vector<4x1xf32> to vector<4x128xf32>
    %44 = arith.subf %40, %43 : vector<4x128xf32>
    %45 = math.absf %44 : vector<4x128xf32>
    %cst_22 = arith.constant 1.000000e+00 : f32
    %46 = vector.broadcast %cst_22 : f32 to vector<4x128xf32>
    %47 = arith.cmpf olt, %45, %46 : vector<4x128xf32>
    %cst_23 = arith.constant 5.000000e-01 : f32
    %48 = vector.broadcast %cst_23 : f32 to vector<4x128xf32>
    %49 = arith.mulf %48, %44 : vector<4x128xf32>
    %50 = arith.mulf %49, %44 : vector<4x128xf32>
    %cst_24 = arith.constant 5.000000e-01 : f32
    %51 = vector.broadcast %cst_24 : f32 to vector<4x128xf32>
    %52 = arith.subf %45, %51 : vector<4x128xf32>
    %53 = arith.select %47, %50, %52 : vector<4x128xi1>, vector<4x128xf32>
    %c1 = arith.constant 1 : index
    %c0_25 = arith.constant 0 : index
    %c0_26 = arith.constant 0 : index
    %54 = vector.load %arg11[%c1, %c0_25, %c0_26] : memref<6x4x128xf32, #tpu.memory_space<vmem>>, vector<1x4x128xf32>
    %55 = vector.shape_cast %54 : vector<1x4x128xf32> to vector<4x128xf32>
    %cst_27 = arith.constant 0.000000e+00 : f32
    %56 = vector.broadcast %cst_27 : f32 to vector<4x128xf32>
    %57 = arith.select %11, %53, %56 : vector<4x128xi1>, vector<4x128xf32>
    %58 = arith.addf %55, %57 : vector<4x128xf32>
    %c1_28 = arith.constant 1 : index
    %c0_29 = arith.constant 0 : index
    %c0_30 = arith.constant 0 : index
    %59 = vector.load %arg11[%c1_28, %c0_29, %c0_30] : memref<6x4x128xf32, #tpu.memory_space<vmem>>, vector<1x4x128xf32>
    %60 = vector.shape_cast %59 : vector<1x4x128xf32> to vector<4x128xf32>
    %61 = vector.shape_cast %58 : vector<4x128xf32> to vector<1x4x128xf32>
    tpu.vector_store %arg11[%c1_28, %c0_29, %c0_30], %61 {strides = array<i32>} : memref<6x4x128xf32, #tpu.memory_space<vmem>>, vector<1x4x128xf32>,
    %c0_31 = arith.constant 0 : index
    %c0_32 = arith.constant 0 : index
    %62 = vector.load %arg6[%c0_31, %c0_32] : memref<4x128xf32, #tpu.memory_space<vmem>>, vector<4x128xf32>
    %63 = vector.extract_strided_slice %17 {offsets = [2, 0, 0], sizes = [1, 4, 1], strides = [1, 1, 1]} : vector<6x4x1xf32> to vector<1x4x1xf32>
    %64 = vector.shape_cast %63 : vector<1x4x1xf32> to vector<4x1xf32>
    %65 = vector.broadcast %64 : vector<4x1xf32> to vector<4x128xf32>
    %66 = arith.subf %62, %65 : vector<4x128xf32>
    %67 = math.absf %66 : vector<4x128xf32>
    %cst_33 = arith.constant 1.000000e+00 : f32
    %68 = vector.broadcast %cst_33 : f32 to vector<4x128xf32>
    %69 = arith.cmpf olt, %67, %68 : vector<4x128xf32>
    %cst_34 = arith.constant 5.000000e-01 : f32
    %70 = vector.broadcast %cst_34 : f32 to vector<4x128xf32>
    %71 = arith.mulf %70, %66 : vector<4x128xf32>
    %72 = arith.mulf %71, %66 : vector<4x128xf32>
    %cst_35 = arith.constant 5.000000e-01 : f32
    %73 = vector.broadcast %cst_35 : f32 to vector<4x128xf32>
    %74 = arith.subf %67, %73 : vector<4x128xf32>
    %75 = arith.select %69, %72, %74 : vector<4x128xi1>, vector<4x128xf32>
    %c2 = arith.constant 2 : index
    %c0_36 = arith.constant 0 : index
    %c0_37 = arith.constant 0 : index
    %76 = vector.load %arg11[%c2, %c0_36, %c0_37] : memref<6x4x128xf32, #tpu.memory_space<vmem>>, vector<1x4x128xf32>
    %77 = vector.shape_cast %76 : vector<1x4x128xf32> to vector<4x128xf32>
    %cst_38 = arith.constant 0.000000e+00 : f32
    %78 = vector.broadcast %cst_38 : f32 to vector<4x128xf32>
    %79 = arith.select %11, %75, %78 : vector<4x128xi1>, vector<4x128xf32>
    %80 = arith.addf %77, %79 : vector<4x128xf32>
    %c2_39 = arith.constant 2 : index
    %c0_40 = arith.constant 0 : index
    %c0_41 = arith.constant 0 : index
    %81 = vector.load %arg11[%c2_39, %c0_40, %c0_41] : memref<6x4x128xf32, #tpu.memory_space<vmem>>, vector<1x4x128xf32>
    %82 = vector.shape_cast %81 : vector<1x4x128xf32> to vector<4x128xf32>
    %83 = vector.shape_cast %80 : vector<4x128xf32> to vector<1x4x128xf32>
    tpu.vector_store %arg11[%c2_39, %c0_40, %c0_41], %83 {strides = array<i32>} : memref<6x4x128xf32, #tpu.memory_space<vmem>>, vector<1x4x128xf32>,
    %c0_42 = arith.constant 0 : index
    %c0_43 = arith.constant 0 : index
    %84 = vector.load %arg7[%c0_42, %c0_43] : memref<4x128xf32, #tpu.memory_space<vmem>>, vector<4x128xf32>
    %85 = vector.extract_strided_slice %17 {offsets = [3, 0, 0], sizes = [1, 4, 1], strides = [1, 1, 1]} : vector<6x4x1xf32> to vector<1x4x1xf32>
    %86 = vector.shape_cast %85 : vector<1x4x1xf32> to vector<4x1xf32>
    %87 = vector.broadcast %86 : vector<4x1xf32> to vector<4x128xf32>
    %88 = arith.subf %84, %87 : vector<4x128xf32>
    %89 = math.absf %88 : vector<4x128xf32>
    %cst_44 = arith.constant 1.000000e+00 : f32
    %90 = vector.broadcast %cst_44 : f32 to vector<4x128xf32>
    %91 = arith.cmpf olt, %89, %90 : vector<4x128xf32>
    %cst_45 = arith.constant 5.000000e-01 : f32
    %92 = vector.broadcast %cst_45 : f32 to vector<4x128xf32>
    %93 = arith.mulf %92, %88 : vector<4x128xf32>
    %94 = arith.mulf %93, %88 : vector<4x128xf32>
    %cst_46 = arith.constant 5.000000e-01 : f32
    %95 = vector.broadcast %cst_46 : f32 to vector<4x128xf32>
    %96 = arith.subf %89, %95 : vector<4x128xf32>
    %97 = arith.select %91, %94, %96 : vector<4x128xi1>, vector<4x128xf32>
    %c3 = arith.constant 3 : index
    %c0_47 = arith.constant 0 : index
    %c0_48 = arith.constant 0 : index
    %98 = vector.load %arg11[%c3, %c0_47, %c0_48] : memref<6x4x128xf32, #tpu.memory_space<vmem>>, vector<1x4x128xf32>
    %99 = vector.shape_cast %98 : vector<1x4x128xf32> to vector<4x128xf32>
    %cst_49 = arith.constant 0.000000e+00 : f32
    %100 = vector.broadcast %cst_49 : f32 to vector<4x128xf32>
    %101 = arith.select %11, %97, %100 : vector<4x128xi1>, vector<4x128xf32>
    %102 = arith.addf %99, %101 : vector<4x128xf32>
    %c3_50 = arith.constant 3 : index
    %c0_51 = arith.constant 0 : index
    %c0_52 = arith.constant 0 : index
    %103 = vector.load %arg11[%c3_50, %c0_51, %c0_52] : memref<6x4x128xf32, #tpu.memory_space<vmem>>, vector<1x4x128xf32>
    %104 = vector.shape_cast %103 : vector<1x4x128xf32> to vector<4x128xf32>
    %105 = vector.shape_cast %102 : vector<4x128xf32> to vector<1x4x128xf32>
    tpu.vector_store %arg11[%c3_50, %c0_51, %c0_52], %105 {strides = array<i32>} : memref<6x4x128xf32, #tpu.memory_space<vmem>>, vector<1x4x128xf32>,
    %c0_53 = arith.constant 0 : index
    %c0_54 = arith.constant 0 : index
    %106 = vector.load %arg8[%c0_53, %c0_54] : memref<4x128xf32, #tpu.memory_space<vmem>>, vector<4x128xf32>
    %107 = vector.extract_strided_slice %17 {offsets = [4, 0, 0], sizes = [1, 4, 1], strides = [1, 1, 1]} : vector<6x4x1xf32> to vector<1x4x1xf32>
    %108 = vector.shape_cast %107 : vector<1x4x1xf32> to vector<4x1xf32>
    %109 = vector.broadcast %108 : vector<4x1xf32> to vector<4x128xf32>
    %110 = arith.subf %106, %109 : vector<4x128xf32>
    %111 = math.absf %110 : vector<4x128xf32>
    %cst_55 = arith.constant 1.000000e+00 : f32
    %112 = vector.broadcast %cst_55 : f32 to vector<4x128xf32>
    %113 = arith.cmpf olt, %111, %112 : vector<4x128xf32>
    %cst_56 = arith.constant 5.000000e-01 : f32
    %114 = vector.broadcast %cst_56 : f32 to vector<4x128xf32>
    %115 = arith.mulf %114, %110 : vector<4x128xf32>
    %116 = arith.mulf %115, %110 : vector<4x128xf32>
    %cst_57 = arith.constant 5.000000e-01 : f32
    %117 = vector.broadcast %cst_57 : f32 to vector<4x128xf32>
    %118 = arith.subf %111, %117 : vector<4x128xf32>
    %119 = arith.select %113, %116, %118 : vector<4x128xi1>, vector<4x128xf32>
    %c4 = arith.constant 4 : index
    %c0_58 = arith.constant 0 : index
    %c0_59 = arith.constant 0 : index
    %120 = vector.load %arg11[%c4, %c0_58, %c0_59] : memref<6x4x128xf32, #tpu.memory_space<vmem>>, vector<1x4x128xf32>
    %121 = vector.shape_cast %120 : vector<1x4x128xf32> to vector<4x128xf32>
    %cst_60 = arith.constant 0.000000e+00 : f32
    %122 = vector.broadcast %cst_60 : f32 to vector<4x128xf32>
    %123 = arith.select %11, %119, %122 : vector<4x128xi1>, vector<4x128xf32>
    %124 = arith.addf %121, %123 : vector<4x128xf32>
    %c4_61 = arith.constant 4 : index
    %c0_62 = arith.constant 0 : index
    %c0_63 = arith.constant 0 : index
    %125 = vector.load %arg11[%c4_61, %c0_62, %c0_63] : memref<6x4x128xf32, #tpu.memory_space<vmem>>, vector<1x4x128xf32>
    %126 = vector.shape_cast %125 : vector<1x4x128xf32> to vector<4x128xf32>
    %127 = vector.shape_cast %124 : vector<4x128xf32> to vector<1x4x128xf32>
    tpu.vector_store %arg11[%c4_61, %c0_62, %c0_63], %127 {strides = array<i32>} : memref<6x4x128xf32, #tpu.memory_space<vmem>>, vector<1x4x128xf32>,
    %c0_64 = arith.constant 0 : index
    %c0_65 = arith.constant 0 : index
    %128 = vector.load %arg9[%c0_64, %c0_65] : memref<4x128xf32, #tpu.memory_space<vmem>>, vector<4x128xf32>
    %129 = vector.extract_strided_slice %17 {offsets = [5, 0, 0], sizes = [1, 4, 1], strides = [1, 1, 1]} : vector<6x4x1xf32> to vector<1x4x1xf32>
    %130 = vector.shape_cast %129 : vector<1x4x1xf32> to vector<4x1xf32>
    %131 = vector.broadcast %130 : vector<4x1xf32> to vector<4x128xf32>
    %132 = arith.subf %128, %131 : vector<4x128xf32>
    %133 = math.absf %132 : vector<4x128xf32>
    %cst_66 = arith.constant 1.000000e+00 : f32
    %134 = vector.broadcast %cst_66 : f32 to vector<4x128xf32>
    %135 = arith.cmpf olt, %133, %134 : vector<4x128xf32>
    %cst_67 = arith.constant 5.000000e-01 : f32
    %136 = vector.broadcast %cst_67 : f32 to vector<4x128xf32>
    %137 = arith.mulf %136, %132 : vector<4x128xf32>
    %138 = arith.mulf %137, %132 : vector<4x128xf32>
    %cst_68 = arith.constant 5.000000e-01 : f32
    %139 = vector.broadcast %cst_68 : f32 to vector<4x128xf32>
    %140 = arith.subf %133, %139 : vector<4x128xf32>
    %141 = arith.select %135, %138, %140 : vector<4x128xi1>, vector<4x128xf32>
    %c5 = arith.constant 5 : index
    %c0_69 = arith.constant 0 : index
    %c0_70 = arith.constant 0 : index
    %142 = vector.load %arg11[%c5, %c0_69, %c0_70] : memref<6x4x128xf32, #tpu.memory_space<vmem>>, vector<1x4x128xf32>
    %143 = vector.shape_cast %142 : vector<1x4x128xf32> to vector<4x128xf32>
    %cst_71 = arith.constant 0.000000e+00 : f32
    %144 = vector.broadcast %cst_71 : f32 to vector<4x128xf32>
    %145 = arith.select %11, %141, %144 : vector<4x128xi1>, vector<4x128xf32>
    %146 = arith.addf %143, %145 : vector<4x128xf32>
    %c5_72 = arith.constant 5 : index
    %c0_73 = arith.constant 0 : index
    %c0_74 = arith.constant 0 : index
    %147 = vector.load %arg11[%c5_72, %c0_73, %c0_74] : memref<6x4x128xf32, #tpu.memory_space<vmem>>, vector<1x4x128xf32>
    %148 = vector.shape_cast %147 : vector<1x4x128xf32> to vector<4x128xf32>
    %149 = vector.shape_cast %146 : vector<4x128xf32> to vector<1x4x128xf32>
    tpu.vector_store %arg11[%c5_72, %c0_73, %c0_74], %149 {strides = array<i32>} : memref<6x4x128xf32, #tpu.memory_space<vmem>>, vector<1x4x128xf32>,
    %c0_i32_75 = arith.constant 0 : i32
    %150 = arith.cmpi eq, %arg1, %c0_i32_75 : i32
    %151 = arith.extui %150 : i1 to i32
    %c0_i32_76 = arith.constant 0 : i32
    %152 = arith.cmpi ne, %151, %c0_i32_76 : i32
    scf.if %152 {
      %c0_77 = arith.constant 0 : index
      %c0_78 = arith.constant 0 : index
      %c0_79 = arith.constant 0 : index
      %153 = vector.load %arg11[%c0_77, %c0_78, %c0_79] : memref<6x4x128xf32, #tpu.memory_space<vmem>>, vector<1x4x128xf32>
      %154 = vector.shape_cast %153 : vector<1x4x128xf32> to vector<4x128xf32>
      %cst_80 = arith.constant dense<0.000000e+00> : vector<4xf32>
      %155 = vector.multi_reduction <add>, %154, %cst_80 [1] : vector<4x128xf32> to vector<4xf32>
      %156 = vector.shape_cast %155 : vector<4xf32> to vector<4x1xf32>
      %c0_81 = arith.constant 0 : index
      %c0_82 = arith.constant 0 : index
      %c0_83 = arith.constant 0 : index
      %c0_84 = arith.constant 0 : index
      %157 = vector.load %arg10[%c0_81, %c0_82, %c0_83, %c0_84] : memref<1x7x4x1xf32, #tpu.memory_space<vmem>>, vector<1x1x4x1xf32>
      %158 = vector.shape_cast %157 : vector<1x1x4x1xf32> to vector<4x1xf32>
      %159 = vector.shape_cast %156 : vector<4x1xf32> to vector<1x1x4x1xf32>
      tpu.vector_store %arg10[%c0_81, %c0_82, %c0_83, %c0_84], %159 {strides = array<i32>} : memref<1x7x4x1xf32, #tpu.memory_space<vmem>>, vector<1x1x4x1xf32>,
      %c1_85 = arith.constant 1 : index
      %c0_86 = arith.constant 0 : index
      %c0_87 = arith.constant 0 : index
      %160 = vector.load %arg11[%c1_85, %c0_86, %c0_87] : memref<6x4x128xf32, #tpu.memory_space<vmem>>, vector<1x4x128xf32>
      %161 = vector.shape_cast %160 : vector<1x4x128xf32> to vector<4x128xf32>
      %cst_88 = arith.constant dense<0.000000e+00> : vector<4xf32>
      %162 = vector.multi_reduction <add>, %161, %cst_88 [1] : vector<4x128xf32> to vector<4xf32>
      %163 = vector.shape_cast %162 : vector<4xf32> to vector<4x1xf32>
      %c0_89 = arith.constant 0 : index
      %c1_90 = arith.constant 1 : index
      %c0_91 = arith.constant 0 : index
      %c0_92 = arith.constant 0 : index
      %164 = vector.load %arg10[%c0_89, %c1_90, %c0_91, %c0_92] : memref<1x7x4x1xf32, #tpu.memory_space<vmem>>, vector<1x1x4x1xf32>
      %165 = vector.shape_cast %164 : vector<1x1x4x1xf32> to vector<4x1xf32>
      %166 = vector.shape_cast %163 : vector<4x1xf32> to vector<1x1x4x1xf32>
      tpu.vector_store %arg10[%c0_89, %c1_90, %c0_91, %c0_92], %166 {strides = array<i32>} : memref<1x7x4x1xf32, #tpu.memory_space<vmem>>, vector<1x1x4x1xf32>,
      %c2_93 = arith.constant 2 : index
      %c0_94 = arith.constant 0 : index
      %c0_95 = arith.constant 0 : index
      %167 = vector.load %arg11[%c2_93, %c0_94, %c0_95] : memref<6x4x128xf32, #tpu.memory_space<vmem>>, vector<1x4x128xf32>
      %168 = vector.shape_cast %167 : vector<1x4x128xf32> to vector<4x128xf32>
      %cst_96 = arith.constant dense<0.000000e+00> : vector<4xf32>
      %169 = vector.multi_reduction <add>, %168, %cst_96 [1] : vector<4x128xf32> to vector<4xf32>
      %170 = vector.shape_cast %169 : vector<4xf32> to vector<4x1xf32>
      %c0_97 = arith.constant 0 : index
      %c2_98 = arith.constant 2 : index
      %c0_99 = arith.constant 0 : index
      %c0_100 = arith.constant 0 : index
      %171 = vector.load %arg10[%c0_97, %c2_98, %c0_99, %c0_100] : memref<1x7x4x1xf32, #tpu.memory_space<vmem>>, vector<1x1x4x1xf32>
      %172 = vector.shape_cast %171 : vector<1x1x4x1xf32> to vector<4x1xf32>
      %173 = vector.shape_cast %170 : vector<4x1xf32> to vector<1x1x4x1xf32>
      tpu.vector_store %arg10[%c0_97, %c2_98, %c0_99, %c0_100], %173 {strides = array<i32>} : memref<1x7x4x1xf32, #tpu.memory_space<vmem>>, vector<1x1x4x1xf32>,
      %c3_101 = arith.constant 3 : index
      %c0_102 = arith.constant 0 : index
      %c0_103 = arith.constant 0 : index
      %174 = vector.load %arg11[%c3_101, %c0_102, %c0_103] : memref<6x4x128xf32, #tpu.memory_space<vmem>>, vector<1x4x128xf32>
      %175 = vector.shape_cast %174 : vector<1x4x128xf32> to vector<4x128xf32>
      %cst_104 = arith.constant dense<0.000000e+00> : vector<4xf32>
      %176 = vector.multi_reduction <add>, %175, %cst_104 [1] : vector<4x128xf32> to vector<4xf32>
      %177 = vector.shape_cast %176 : vector<4xf32> to vector<4x1xf32>
      %c0_105 = arith.constant 0 : index
      %c3_106 = arith.constant 3 : index
      %c0_107 = arith.constant 0 : index
      %c0_108 = arith.constant 0 : index
      %178 = vector.load %arg10[%c0_105, %c3_106, %c0_107, %c0_108] : memref<1x7x4x1xf32, #tpu.memory_space<vmem>>, vector<1x1x4x1xf32>
      %179 = vector.shape_cast %178 : vector<1x1x4x1xf32> to vector<4x1xf32>
      %180 = vector.shape_cast %177 : vector<4x1xf32> to vector<1x1x4x1xf32>
      tpu.vector_store %arg10[%c0_105, %c3_106, %c0_107, %c0_108], %180 {strides = array<i32>} : memref<1x7x4x1xf32, #tpu.memory_space<vmem>>, vector<1x1x4x1xf32>,
      %c4_109 = arith.constant 4 : index
      %c0_110 = arith.constant 0 : index
      %c0_111 = arith.constant 0 : index
      %181 = vector.load %arg11[%c4_109, %c0_110, %c0_111] : memref<6x4x128xf32, #tpu.memory_space<vmem>>, vector<1x4x128xf32>
      %182 = vector.shape_cast %181 : vector<1x4x128xf32> to vector<4x128xf32>
      %cst_112 = arith.constant dense<0.000000e+00> : vector<4xf32>
      %183 = vector.multi_reduction <add>, %182, %cst_112 [1] : vector<4x128xf32> to vector<4xf32>
      %184 = vector.shape_cast %183 : vector<4xf32> to vector<4x1xf32>
      %c0_113 = arith.constant 0 : index
      %c4_114 = arith.constant 4 : index
      %c0_115 = arith.constant 0 : index
      %c0_116 = arith.constant 0 : index
      %185 = vector.load %arg10[%c0_113, %c4_114, %c0_115, %c0_116] : memref<1x7x4x1xf32, #tpu.memory_space<vmem>>, vector<1x1x4x1xf32>
      %186 = vector.shape_cast %185 : vector<1x1x4x1xf32> to vector<4x1xf32>
      %187 = vector.shape_cast %184 : vector<4x1xf32> to vector<1x1x4x1xf32>
      tpu.vector_store %arg10[%c0_113, %c4_114, %c0_115, %c0_116], %187 {strides = array<i32>} : memref<1x7x4x1xf32, #tpu.memory_space<vmem>>, vector<1x1x4x1xf32>,
      %c5_117 = arith.constant 5 : index
      %c0_118 = arith.constant 0 : index
      %c0_119 = arith.constant 0 : index
      %188 = vector.load %arg11[%c5_117, %c0_118, %c0_119] : memref<6x4x128xf32, #tpu.memory_space<vmem>>, vector<1x4x128xf32>
      %189 = vector.shape_cast %188 : vector<1x4x128xf32> to vector<4x128xf32>
      %cst_120 = arith.constant dense<0.000000e+00> : vector<4xf32>
      %190 = vector.multi_reduction <add>, %189, %cst_120 [1] : vector<4x128xf32> to vector<4xf32>
      %191 = vector.shape_cast %190 : vector<4xf32> to vector<4x1xf32>
      %c0_121 = arith.constant 0 : index
      %c5_122 = arith.constant 5 : index
      %c0_123 = arith.constant 0 : index
      %c0_124 = arith.constant 0 : index
      %192 = vector.load %arg10[%c0_121, %c5_122, %c0_123, %c0_124] : memref<1x7x4x1xf32, #tpu.memory_space<vmem>>, vector<1x1x4x1xf32>
      %193 = vector.shape_cast %192 : vector<1x1x4x1xf32> to vector<4x1xf32>
      %194 = vector.shape_cast %191 : vector<4x1xf32> to vector<1x1x4x1xf32>
      tpu.vector_store %arg10[%c0_121, %c5_122, %c0_123, %c0_124], %194 {strides = array<i32>} : memref<1x7x4x1xf32, #tpu.memory_space<vmem>>, vector<1x1x4x1xf32>,
      %c0_125 = arith.constant 0 : index
      %c0_126 = arith.constant 0 : index
      %195 = vector.load %arg12[%c0_125, %c0_126] : memref<4x128xf32, #tpu.memory_space<vmem>>, vector<4x128xf32>
      %cst_127 = arith.constant dense<0.000000e+00> : vector<4xf32>
      %196 = vector.multi_reduction <add>, %195, %cst_127 [1] : vector<4x128xf32> to vector<4xf32>
      %197 = vector.shape_cast %196 : vector<4xf32> to vector<4x1xf32>
      %c0_128 = arith.constant 0 : index
      %c6 = arith.constant 6 : index
      %c0_129 = arith.constant 0 : index
      %c0_130 = arith.constant 0 : index
      %198 = vector.load %arg10[%c0_128, %c6, %c0_129, %c0_130] : memref<1x7x4x1xf32, #tpu.memory_space<vmem>>, vector<1x1x4x1xf32>
      %199 = vector.shape_cast %198 : vector<1x1x4x1xf32> to vector<4x1xf32>
      %200 = vector.shape_cast %197 : vector<4x1xf32> to vector<1x1x4x1xf32>
      tpu.vector_store %arg10[%c0_128, %c6, %c0_129, %c0_130], %200 {strides = array<i32>} : memref<1x7x4x1xf32, #tpu.memory_space<vmem>>, vector<1x1x4x1xf32>,
    } else {
    }
    return
  }
  func.func @transform_0(%arg0: i32, %arg1: i32) -> (i32, i32) {
    %c0_i32 = arith.constant 0 : i32
    %c0_i32_0 = arith.constant 0 : i32
    %c0_i32_1 = arith.constant 0 : i32
    return %c0_i32, %c0_i32_0 : i32, i32
  }
  func.func @transform_1(%arg0: i32, %arg1: i32) -> (i32, i32, i32) {
    %c0_i32 = arith.constant 0 : i32
    %c0_i32_0 = arith.constant 0 : i32
    %c0_i32_1 = arith.constant 0 : i32
    %c0_i32_2 = arith.constant 0 : i32
    return %c0_i32, %c0_i32_0, %c0_i32_1 : i32, i32, i32
  }
  func.func @transform_2(%arg0: i32, %arg1: i32) -> (i32, i32) {
    %c1_i32 = arith.constant 1 : i32
    %0 = arith.muli %arg0, %c1_i32 : i32
    %1 = arith.addi %0, %arg1 : i32
    %c0_i32 = arith.constant 0 : i32
    %2 = arith.minsi %1, %c0_i32 : i32
    %c0_i32_0 = arith.constant 0 : i32
    %c0_i32_1 = arith.constant 0 : i32
    return %c0_i32_0, %2 : i32, i32
  }
  func.func @transform_3(%arg0: i32, %arg1: i32) -> (i32, i32) {
    %c1_i32 = arith.constant 1 : i32
    %0 = arith.muli %arg0, %c1_i32 : i32
    %1 = arith.addi %0, %arg1 : i32
    %c0_i32 = arith.constant 0 : i32
    %2 = arith.minsi %1, %c0_i32 : i32
    %c0_i32_0 = arith.constant 0 : i32
    %c0_i32_1 = arith.constant 0 : i32
    return %c0_i32_0, %2 : i32, i32
  }
  func.func @transform_4(%arg0: i32, %arg1: i32) -> (i32, i32) {
    %c1_i32 = arith.constant 1 : i32
    %0 = arith.muli %arg0, %c1_i32 : i32
    %1 = arith.addi %0, %arg1 : i32
    %c0_i32 = arith.constant 0 : i32
    %2 = arith.minsi %1, %c0_i32 : i32
    %c0_i32_0 = arith.constant 0 : i32
    %c0_i32_1 = arith.constant 0 : i32
    return %c0_i32_0, %2 : i32, i32
  }
  func.func @transform_5(%arg0: i32, %arg1: i32) -> (i32, i32) {
    %c1_i32 = arith.constant 1 : i32
    %0 = arith.muli %arg0, %c1_i32 : i32
    %1 = arith.addi %0, %arg1 : i32
    %c0_i32 = arith.constant 0 : i32
    %2 = arith.minsi %1, %c0_i32 : i32
    %c0_i32_0 = arith.constant 0 : i32
    %c0_i32_1 = arith.constant 0 : i32
    return %c0_i32_0, %2 : i32, i32
  }
  func.func @transform_6(%arg0: i32, %arg1: i32) -> (i32, i32) {
    %c1_i32 = arith.constant 1 : i32
    %0 = arith.muli %arg0, %c1_i32 : i32
    %1 = arith.addi %0, %arg1 : i32
    %c0_i32 = arith.constant 0 : i32
    %2 = arith.minsi %1, %c0_i32 : i32
    %c0_i32_0 = arith.constant 0 : i32
    %c0_i32_1 = arith.constant 0 : i32
    return %c0_i32_0, %2 : i32, i32
  }
  func.func @transform_7(%arg0: i32, %arg1: i32) -> (i32, i32) {
    %c1_i32 = arith.constant 1 : i32
    %0 = arith.muli %arg0, %c1_i32 : i32
    %1 = arith.addi %0, %arg1 : i32
    %c0_i32 = arith.constant 0 : i32
    %2 = arith.minsi %1, %c0_i32 : i32
    %c0_i32_0 = arith.constant 0 : i32
    %c0_i32_1 = arith.constant 0 : i32
    return %c0_i32_0, %2 : i32, i32
  }
  func.func @transform_8(%arg0: i32, %arg1: i32) -> (i32, i32, i32, i32) {
    %c0_i32 = arith.constant 0 : i32
    %c0_i32_0 = arith.constant 0 : i32
    %c0_i32_1 = arith.constant 0 : i32
    %c0_i32_2 = arith.constant 0 : i32
    return %arg0, %c0_i32, %c0_i32_0, %c0_i32_1 : i32, i32, i32, i32
  }
}

</mosaic_0001>

<bundles_post_ra>
// kernel: tpu_custom_call.1
= control target key start
LH: loop header
LB: loop body
LE: loop exit
PB: predicated region body
PF: predicated region fallthrough
CT: control target
= control target key end

     0   :  { %v434_v0 = vmov 0   ;;  %v435_v7 = vmov 0.0   ;;  %v204_v17 = vlaneseq  ;;  %vm335_vm7 = vcmask 1043456   ;;  %s592_s1 = inlined_call_operand.vmem [shape: f32[6,4,1], index: 1, kind: input, shape index: {}]   ;;  %s593_s0 = inlined_call_operand.vmem [shape: s32[4,1], index: 0, kind: input, shape index: {}]   ;;  %s594_s4 = inlined_call_operand.vmem [shape: f32[4,26], index: 4, kind: input, shape index: {}]   ;;  %s595_s2 = inlined_call_operand.vmem [shape: f32[4,26], index: 2, kind: input, shape index: {}]   ;;  %s596_s5 = inlined_call_operand.vmem [shape: f32[4,26], index: 5, kind: input, shape index: {}]   ;;  %s597_s3 = inlined_call_operand.vmem [shape: f32[4,26], index: 3, kind: input, shape index: {}]   ;;  %s598_s7 = inlined_call_operand.vmem [shape: f32[4,26], index: 7, kind: input, shape index: {}]   ;;  %s599_s6 = inlined_call_operand.vmem [shape: f32[4,26], index: 6, kind: input, shape index: {}]   ;;  %s600_s8 = inlined_call_operand.vmem [shape: f32[1,7,4,1], index: 8, kind: output, shape index: {}]  }
   0x1   :  { %433 = vset.pattern.permute.xlu1 %v434_v0  ;;  %432 = vset.pattern.permute.xlu0 %v434_v0  ;;  %v220_v1 = vld [vmem:[%s592_s1 + $0x8] sm:$0xf]  ;;  %v218_v2 = vld [vmem:[%s592_s1] sm:$0xf]  ;;  %v221_v3 = vld [vmem:[%s592_s1 + $0xc] sm:$0xf] }
   0x2   :  { %262 = vperm.xlu1 %433, %v220_v1   ;;  %227 = vperm.xlu0 %432, %v218_v2   ;;  %v219_v4 = vld [vmem:[%s592_s1 + $0x4] sm:$0xf]  ;;  %v223_v5 = vld [vmem:[%s592_s1 + $0x14] sm:$0xf]  ;;  %v222_v6 = vld [vmem:[%s592_s1 + $0x10] sm:$0xf] }
   0x3   :  { %195 = vst [vmem:[#allocation2] sm:$0xf] %v435_v7  ;;  %196 = vst [vmem:[#allocation2 + $0x4] sm:$0xf] %v435_v7  ;;  %v208_v8 = vld [vmem:[%s593_s0] sm:$0xf] }
   0x4   :  { %197 = vst [vmem:[#allocation2 + $0x8] sm:$0xf] %v435_v7  ;;  %198 = vst [vmem:[#allocation2 + $0xc] sm:$0xf] %v435_v7  ;;  %v259_v9 = vld [vmem:[%s594_s4] sm:$0xf] }
   0x5   :  { %199 = vst [vmem:[#allocation2 + $0x10] sm:$0xf] %v435_v7  ;;  %200 = vst [vmem:[#allocation2 + $0x14] sm:$0xf] %v435_v7  ;;  %v224_v10 = vld [vmem:[%s595_s2] sm:$0xf] }
   0x6   :  { %280 = vperm.xlu1 %433, %v221_v3   ;;  %244 = vperm.xlu0 %432, %v219_v4   ;;  %201 = vst [vmem:[#allocation3] sm:$0xf] %v435_v7  ;;  %v277_v15 = vld [vmem:[%s596_s5] sm:$0xf]  ;;  %v205_v33 = vand.u32 127, %v204_v17  ;;  %vm339_vm8 = vcmask 3072  }
   0x7   :  { %v241_v16 = vld [vmem:[%s597_s3] sm:$0xf] }
   0x8   :  { %v313_v29 = vld [vmem:[%s598_s7] sm:$0xf] }
   0x9   :  { %v295_v30 = vld [vmem:[%s599_s6] sm:$0xf] }
   0xa   :  { %316 = vperm.xlu1 %433, %v223_v5   ;;  %298 = vperm.xlu0 %432, %v222_v6   ;;  %v237_v57 = vld [vmem:[#allocation2] sm:$0xf]  ;;  %v255_v63 = vld [vmem:[#allocation2 + $0x4] sm:$0xf] }
   0xb   :  { %v273_v0 = vld [vmem:[#allocation2 + $0x8] sm:$0xf]  ;;  %v291_v4 = vld [vmem:[#allocation2 + $0xc] sm:$0xf] }
   0xc   :  { %v309_v5 = vld [vmem:[#allocation2 + $0x10] sm:$0xf] }
   0xd   :  { %v213_v52 = vld [vmem:[#allocation3] sm:$0xf] }
   0xe   :  { %210 = vperm.xlu0 %432, %v208_v8   ;;  %v327_v8 = vld [vmem:[#allocation2 + $0x14] sm:$0xf] }
  0x81   :  { %v263_v11 = vpop.permute.xlu1 %262  ;;  %v228_v12 = vpop.permute.xlu0 %227 }
  0x82   :  { %v265_v13 = vsub.f32 %v259_v9, %v263_v11  ;;  %v230_v14 = vsub.f32 %v224_v10, %v228_v12 }
  0x84   :  { %v266_v18 = vand.u32 2147483647, %v265_v13  ;;  %v268_v19 = vmul.f32 0.5, %v265_v13  ;;  %v231_v20 = vand.u32 2147483647, %v230_v14  ;;  %v233_v21 = vmul.f32 0.5, %v230_v14 }
  0x85   :  { %v281_v22 = vpop.permute.xlu1 %280  ;;  %v245_v23 = vpop.permute.xlu0 %244 }
  0x86   :  { %v269_v24 = vmul.f32 %v268_v19, %v265_v13  ;;  %v420_v25 = vadd.f32 -0.5, %v266_v18  ;;  %vm521_vm0 = vcmp.lt.f32.partialorder %v266_v18, 1.0  ;;  %v283_v27 = vsub.f32 %v277_v15, %v281_v22 }
  0x87   :  { %v247_v28 = vsub.f32 %v241_v16, %v245_v23  ;;  %vm531_vm1 = vcmp.lt.f32.partialorder %v231_v20, 1.0  ;;  %v234_v32 = vmul.f32 %v233_v21, %v230_v14  ;;  %v418_v34 = vadd.f32 -0.5, %v231_v20 }
  0x88   :  { %v284_v35 = vand.u32 2147483647, %v283_v27  ;;  %v286_v36 = vmul.f32 0.5, %v283_v27  ;;  %v271_v40 = vsel %vm521_vm0, %v269_v24, %v420_v25 }
  0x89   :  { %v248_v37 = vand.u32 2147483647, %v247_v28  ;;  %v317_v38 = vpop.permute.xlu1 %316  ;;  %v299_v39 = vpop.permute.xlu0 %298  ;;  %v250_v41 = vmul.f32 0.5, %v247_v28  ;;  %v236_v53 = vsel %vm531_vm1, %v234_v32, %v418_v34 }
  0x8a   :  { %v319_v42 = vsub.f32 %v313_v29, %v317_v38  ;;  %v301_v43 = vsub.f32 %v295_v30, %v299_v39  ;;  %vm537_vm2 = vcmp.lt.f32.partialorder %v284_v35, 1.0  ;;  %v287_v45 = vmul.f32 %v286_v36, %v283_v27 }
  0x8b   :  { %v421_v46 = vadd.f32 -0.5, %v284_v35  ;;  %vm541_vm3 = vcmp.lt.f32.partialorder %v248_v37, 1.0  ;;  %v251_v48 = vmul.f32 %v250_v41, %v247_v28  ;;  %v419_v49 = vadd.f32 -0.5, %v248_v37 }
  0x8c   :  { %v320_v50 = vand.u32 2147483647, %v319_v42  ;;  %v322_v51 = vmul.f32 0.5, %v319_v42  ;;  %v302_v55 = vand.u32 2147483647, %v301_v43  ;;  %v304_v56 = vmul.f32 0.5, %v301_v43 }
  0x8d   :  { %v289_v54 = vsel %vm537_vm2, %v287_v45, %v421_v46  ;;  %v211_v58 = vpop.permute.xlu0 %210  ;;  %v253_v59 = vsel %vm541_vm3, %v251_v48, %v419_v49 }
  0x8e   :  { %vm551_vm4 = vcmp.lt.f32.partialorder %v320_v50, 1.0  ;;  %v323_v61 = vmul.f32 %v322_v51, %v319_v42  ;;  %v423_v62 = vadd.f32 -0.5, %v320_v50  ;;  %vm555_vm5 = vcmp.lt.f32.partialorder %v302_v55, 1.0 }
  0x8f   :  { %v305_v2 = vmul.f32 %v304_v56, %v301_v43  ;;  %v422_v3 = vadd.f32 -0.5, %v302_v55  ;;  %vm212_vm6 = vcmp.lt.s32.totalorder %v205_v33, %v211_v58 }
  0x90   :  { %v325_v6 = vsel %vm551_vm4, %v323_v61, %v423_v62  ;;  %v417_v9 = vsel %vm212_vm6, 1.0, %v435_v7  ;;  %v238_v10 = vsel %vm212_vm6, %v236_v53, 0.0  ;;  %v256_v11 = vsel %vm212_vm6, %v253_v59, 0.0 }
  0x91   :  { %v307_v12 = vsel %vm555_vm5, %v305_v2, %v422_v3  ;;  %v216_v13 = vadd.f32 %v417_v9, %v213_v52  ;;  %v239_v14 = vadd.f32 %v238_v10, %v237_v57  ;;  %v257_v15 = vadd.f32 %v256_v11, %v255_v63 }
  0x92   :  { %v274_v16 = vsel %vm212_vm6, %v271_v40, 0.0  ;;  %v292_v17 = vsel %vm212_vm6, %v289_v54, 0.0  ;;  %v310_v18 = vsel %vm212_vm6, %v307_v12, 0.0  ;;  %v328_v19 = vsel %vm212_vm6, %v325_v6, 0.0 }
  0x93   :  { %217 = vst [vmem:[#allocation3] sm:$0xf] %v216_v13  ;;  %240 = vst [vmem:[#allocation2] sm:$0xf] %v239_v14  ;;  %v275_v20 = vadd.f32 %v274_v16, %v273_v0  ;;  %v293_v21 = vadd.f32 %v292_v17, %v291_v4  ;;  %v311_v22 = vadd.f32 %v310_v18, %v309_v5 }
  0x94   :  { %258 = vst [vmem:[#allocation2 + $0x4] sm:$0xf] %v257_v15  ;;  %v329_v23 = vadd.f32 %v328_v19, %v327_v8 }
  0x95   :  { %276 = vst [vmem:[#allocation2 + $0x8] sm:$0xf] %v275_v20  ;;  %294 = vst [vmem:[#allocation2 + $0xc] sm:$0xf] %v293_v21 }
  0x96   :  { %312 = vst [vmem:[#allocation2 + $0x10] sm:$0xf] %v311_v22  ;;  %330 = vst [vmem:[#allocation2 + $0x14] sm:$0xf] %v329_v23 }
  0x9a   :  { %v334_v24 = vld [vmem:[#allocation2] sm:$0xf]  ;;  %v371_v35 = vld [vmem:[#allocation3] sm:$0xf] }
  0x9b   :  { %v341_v7 = vld [vmem:[#allocation2 + $0x4] sm:$0xf]  ;;  %v336_v26 = vsel %vm335_vm7, %v334_v24, 0.0  ;;  %v372_v36 = vsel %vm335_vm7, %v371_v35, 0.0 }
  0x9c   :  { %v342_v25 = vsel %vm335_vm7, %v341_v7, 0.0  ;;  %337 = vadd.xlane.f32.xlu1 %v336_v26  ;;  %v347_v27 = vld [vmem:[#allocation2 + $0x8] sm:$0xf]  ;;  %v353_v28 = vld [vmem:[#allocation2 + $0xc] sm:$0xf] }
  0x9d   :  { %343 = vadd.xlane.f32.xlu0 %v342_v25  ;;  %v348_v29 = vsel %vm335_vm7, %v347_v27, 0.0  ;;  %v354_v30 = vsel %vm335_vm7, %v353_v28, 0.0  ;;  %v359_v31 = vld [vmem:[#allocation2 + $0x10] sm:$0xf]  ;;  %v365_v32 = vld [vmem:[#allocation2 + $0x14] sm:$0xf] }
  0x9e   :  { %v360_v33 = vsel %vm335_vm7, %v359_v31, 0.0  ;;  %v366_v34 = vsel %vm335_vm7, %v365_v32, 0.0 }
  0xa0   :  { %355 = vadd.xlane.f32.xlu1 %v354_v30 }
  0xa1   :  { %349 = vadd.xlane.f32.xlu0 %v348_v29 }
  0xa4   :  { %367 = vadd.xlane.f32.xlu1 %v366_v34 }
  0xa5   :  { %361 = vadd.xlane.f32.xlu0 %v360_v33 }
  0xa9   :  { %373 = vadd.xlane.f32.xlu0 %v372_v36 }
 0x129   :  { %v338_v38 = vpop.xlane.xlu1 %337 }
 0x12a   :  { %v344_v37 = vpop.xlane.xlu0 %343  ;;  %340 = vst.msk [vmem:[%s600_s8] sm:$0xf] %vm339_vm8, %v338_v38 }
 0x12b   :  { %424 = vst.msk [vmem:[%s600_s8 + $0x4] sm:$0xf] %vm339_vm8, %v344_v37 }
 0x12d   :  { %v356_v40 = vpop.xlane.xlu1 %355 }
 0x12e   :  { %v350_v39 = vpop.xlane.xlu0 %349  ;;  %426 = vst.msk [vmem:[%s600_s8 + $0xc] sm:$0xf] %vm339_vm8, %v356_v40 }
 0x12f   :  { %425 = vst.msk [vmem:[%s600_s8 + $0x8] sm:$0xf] %vm339_vm8, %v350_v39 }
 0x131   :  { %v368_v42 = vpop.xlane.xlu1 %367 }
 0x132   :  { %v362_v41 = vpop.xlane.xlu0 %361  ;;  %428 = vst.msk [vmem:[%s600_s8 + $0x14] sm:$0xf] %vm339_vm8, %v368_v42 }
 0x133   :  { %427 = vst.msk [vmem:[%s600_s8 + $0x10] sm:$0xf] %vm339_vm8, %v362_v41 }
 0x136   :  { %v374_v43 = vpop.xlane.xlu0 %373 }
 0x137   :  { %429 = vst.msk [vmem:[%s600_s8 + $0x18] sm:$0xf] %vm339_vm8, %v374_v43 }

</bundles_post_ra>
